<compile_context>
chip_gen: v5e
topology: v5e:2x2
jax: 0.10.0
libtpu: 0.0.40
codegen_flags: <defaults>
</compile_context>

<pallas_src>
import jax
import jax.numpy as jnp
from jax.experimental import pallas as pl
from jax.experimental.pallas import tpu as pltpu


# ----------------------------------------------------------------------------
# Fused kernel: 1x1 conv (channel mix) + block-diagonal graph matmul
# ----------------------------------------------------------------------------
def _ctg_kernel(x_ref, abd_ref, w_ref, b_ref, out_ref):
    """Per-sample fused ConvTemporalGraphical.

    x_ref:   (1, Cin, T*V)   input sample, channels-first, (T,V) flattened
    abd_ref: (T*V, T*V)      block-diagonal adjacency (block t == A[t])
    w_ref:   (Cout, Cin)     1x1 conv weight
    b_ref:   (Cout, 1)       conv bias
    out_ref: (1, Cout, T*V)  lane-dense output slab
    """
    x = x_ref[0]                                              # (Cin, T*V)
    # 1x1 conv over channels: one small matmul.
    h = jnp.dot(w_ref[...], x,
                preferred_element_type=jnp.float32) + b_ref[...]   # (Cout, T*V)
    # Graph contraction: einsum('nctv,tvw->nctw') == h @ block_diag(A[0..T-1]).
    # Single MXU push with K = T*V (=128 for the demo shapes).
    y = jnp.dot(h, abd_ref[...],
                preferred_element_type=jnp.float32)                 # (Cout, T*V)
    out_ref[0] = y.astype(out_ref.dtype)


# ----------------------------------------------------------------------------
# Wrapper: parameter / operand prep (free reshapes) + pallas_call
# ----------------------------------------------------------------------------
def conv_temporal_graphical(x, A, weight, bias):
    """Forward of ConvTemporalGraphical.

    x:      (N, Cin, T, V)   float32
    A:      (K, V, V) with K == T (required by the einsum, as in PyTorch)
    weight: (Cout, Cin, 1, 1)  PyTorch Conv2d weight (t_kernel_size=1)
    bias:   (Cout,)
    returns (out (N, Cout, T, V), A)
    """
    N, Cin, T, V = x.shape
    K = A.shape[0]
    assert K == T, "adjacency spatial-kernel dim must equal T (as in the einsum)"
    Cout = weight.shape[0]
    TV = T * V

    # Host-side prep: pure contiguous reshapes (no HBM transpose) plus the
    # block-diagonal adjacency Abd[t*V+v, s*V+w] = A[t,v,w] * (t==s).
    x_flat = x.reshape(N, Cin, TV)
    w2d = weight.reshape(Cout, Cin).astype(jnp.float32)
    b2d = bias.reshape(Cout, 1).astype(jnp.float32)
    eye = jnp.eye(T, dtype=jnp.float32)
    a_bd = (A.astype(jnp.float32)[:, :, None, :]
            * eye[:, None, :, None]).reshape(TV, TV)

    out_flat = pl.pallas_call(
        _ctg_kernel,
        grid=(N,),
        out_shape=jax.ShapeDtypeStruct((N, Cout, TV), jnp.float32),
        in_specs=[
            pl.BlockSpec((1, Cin, TV), lambda n: (n, 0, 0)),   # per-sample input
            pl.BlockSpec((TV, TV), lambda n: (0, 0)),          # replicated Abd
            pl.BlockSpec((Cout, Cin), lambda n: (0, 0)),       # replicated weight
            pl.BlockSpec((Cout, 1), lambda n: (0, 0)),         # replicated bias
        ],
        out_specs=pl.BlockSpec((1, Cout, TV), lambda n: (n, 0, 0)),
        compiler_params=pltpu.CompilerParams(
            dimension_semantics=("parallel",)),   # v7x: split batch across TCs
    )(x_flat, a_bd, w2d, b2d)

    out = out_flat.reshape(N, Cout, T, V)          # free minor-dim split
    return out, A


# ----------------------------------------------------------------------------
if __name__ == "__main__":
    # Small shapes consistent with the module: T*V = 128 (one full lane row).
    N, Cin, Cout, T, V = 2, 4, 8, 8, 16

    key = jax.random.PRNGKey(0)
    kx, ka, kw, kb = jax.random.split(key, 4)
    x = jax.random.normal(kx, (N, Cin, T, V), dtype=jnp.float32)
    A = jax.random.normal(ka, (T, V, V), dtype=jnp.float32)
    weight = 0.2 * jax.random.normal(kw, (Cout, Cin, 1, 1), dtype=jnp.float32)
    bias = 0.1 * jax.random.normal(kb, (Cout,), dtype=jnp.float32)

    out, a_out = conv_temporal_graphical(x, A, weight, bias)
    out, a_out = jax.block_until_ready((out, a_out))

    # Pure-JAX reference mirroring the PyTorch forward.
    conv_ref = jnp.einsum('oi,nitv->notv', weight.reshape(Cout, Cin), x,
                          precision=jax.lax.Precision.HIGHEST) \
        + bias[None, :, None, None]
    ref = jnp.einsum('nctv,tvw->nctw', conv_ref, A,
                     precision=jax.lax.Precision.HIGHEST)

    assert out.shape == (N, Cout, T, V)
    assert a_out.shape == (T, V, V)
    assert bool(jnp.all(jnp.isfinite(out)))
    max_err = float(jnp.max(jnp.abs(out - ref)))
    assert jnp.allclose(out, ref, atol=2e-2, rtol=2e-2), max_err

    print("KERNEL_OK")
</pallas_src>

<mosaic_0001>
module attributes {stable_mosaic.version = 11 : i64} {
  func.func @_ctg_kernel(%arg0: i32, %arg1: memref<1x4x128xf32, #tpu.memory_space<vmem>>, %arg2: memref<128x128xf32, #tpu.memory_space<vmem>>, %arg3: memref<8x4xf32, #tpu.memory_space<vmem>>, %arg4: memref<8x1xf32, #tpu.memory_space<vmem>>, %arg5: memref<1x8x128xf32, #tpu.memory_space<vmem>>) attributes {dimension_semantics = [#tpu.dimension_semantics<parallel>], iteration_bounds = array<i64: 2>, scalar_prefetch = 0 : i64, scratch_operands = 0 : i64, tpu.core_type = #tpu.core_type<tc>, window_params = [{transform_indices = @transform_0, window_bounds = array<i64: 1, 4, 128>}, {pipeline_mode = #tpu.pipeline_mode<synchronous>, transform_indices = @transform_1, window_bounds = array<i64: 128, 128>}, {pipeline_mode = #tpu.pipeline_mode<synchronous>, transform_indices = @transform_2, window_bounds = array<i64: 8, 4>}, {pipeline_mode = #tpu.pipeline_mode<synchronous>, transform_indices = @transform_3, window_bounds = array<i64: 8, 1>}, {transform_indices = @transform_4, window_bounds = array<i64: 1, 8, 128>}]} {
    %c0 = arith.constant 0 : index
    %c0_0 = arith.constant 0 : index
    %c0_1 = arith.constant 0 : index
    %0 = vector.load %arg1[%c0, %c0_0, %c0_1] : memref<1x4x128xf32, #tpu.memory_space<vmem>>, vector<1x4x128xf32>
    %1 = vector.shape_cast %0 : vector<1x4x128xf32> to vector<4x128xf32>
    %c0_2 = arith.constant 0 : index
    %c0_3 = arith.constant 0 : index
    %2 = vector.load %arg3[%c0_2, %c0_3] : memref<8x4xf32, #tpu.memory_space<vmem>>, vector<8x4xf32>
    %cst = arith.constant dense<0.000000e+00> : vector<8x128xf32>
    %3 = tpu.matmul %2, %1, %cst {dimension_numbers = #tpu.dot_dimension_numbers<[1], [0], [0], [1], [0, 0, 1, 1], [], []>} : vector<8x4xf32>, vector<4x128xf32>, vector<8x128xf32> -> vector<8x128xf32>
    %c0_4 = arith.constant 0 : index
    %c0_5 = arith.constant 0 : index
    %4 = vector.load %arg4[%c0_4, %c0_5] : memref<8x1xf32, #tpu.memory_space<vmem>>, vector<8x1xf32>
    %5 = vector.broadcast %4 : vector<8x1xf32> to vector<8x128xf32>
    %6 = arith.addf %3, %5 : vector<8x128xf32>
    %c0_6 = arith.constant 0 : index
    %c0_7 = arith.constant 0 : index
    %7 = vector.load %arg2[%c0_6, %c0_7] : memref<128x128xf32, #tpu.memory_space<vmem>>, vector<128x128xf32>
    %cst_8 = arith.constant dense<0.000000e+00> : vector<8x128xf32>
    %8 = tpu.matmul %6, %7, %cst_8 {dimension_numbers = #tpu.dot_dimension_numbers<[1], [0], [0], [1], [0, 0, 1, 1], [], []>} : vector<8x128xf32>, vector<128x128xf32>, vector<8x128xf32> -> vector<8x128xf32>
    %c0_9 = arith.constant 0 : index
    %c0_10 = arith.constant 0 : index
    %c0_11 = arith.constant 0 : index
    %9 = vector.load %arg5[%c0_9, %c0_10, %c0_11] : memref<1x8x128xf32, #tpu.memory_space<vmem>>, vector<1x8x128xf32>
    %10 = vector.shape_cast %9 : vector<1x8x128xf32> to vector<8x128xf32>
    %11 = vector.shape_cast %8 : vector<8x128xf32> to vector<1x8x128xf32>
    tpu.vector_store %arg5[%c0_9, %c0_10, %c0_11], %11 {strides = array<i32>} : memref<1x8x128xf32, #tpu.memory_space<vmem>>, vector<1x8x128xf32>,
    return
  }
  func.func @transform_0(%arg0: i32) -> (i32, i32, i32) {
    %c0_i32 = arith.constant 0 : i32
    %c0_i32_0 = arith.constant 0 : i32
    %c0_i32_1 = arith.constant 0 : i32
    return %arg0, %c0_i32, %c0_i32_0 : i32, i32, i32
  }
  func.func @transform_1(%arg0: i32) -> (i32, i32) {
    %c0_i32 = arith.constant 0 : i32
    %c0_i32_0 = arith.constant 0 : i32
    %c0_i32_1 = arith.constant 0 : i32
    return %c0_i32, %c0_i32_0 : i32, i32
  }
  func.func @transform_2(%arg0: i32) -> (i32, i32) {
    %c0_i32 = arith.constant 0 : i32
    %c0_i32_0 = arith.constant 0 : i32
    %c0_i32_1 = arith.constant 0 : i32
    return %c0_i32, %c0_i32_0 : i32, i32
  }
  func.func @transform_3(%arg0: i32) -> (i32, i32) {
    %c0_i32 = arith.constant 0 : i32
    %c0_i32_0 = arith.constant 0 : i32
    %c0_i32_1 = arith.constant 0 : i32
    return %c0_i32, %c0_i32_0 : i32, i32
  }
  func.func @transform_4(%arg0: i32) -> (i32, i32, i32) {
    %c0_i32 = arith.constant 0 : i32
    %c0_i32_0 = arith.constant 0 : i32
    %c0_i32_1 = arith.constant 0 : i32
    return %arg0, %c0_i32, %c0_i32_0 : i32, i32, i32
  }
}

</mosaic_0001>

<bundles_post_ra>
// kernel: tpu_custom_call.1
= control target key start
LH: loop header
LB: loop body
LE: loop exit
PB: predicated region body
PF: predicated region fallthrough
CT: control target
= control target key end

     0   :  { %9 = vsyncpa [#allocation3], 0  ;;  %s666_s0 = inlined_call_operand.vmem [shape: f32[2,4,128], index: 0, kind: input, shape index: {}]   ;;  %s667_s1 = inlined_call_operand.hbm [shape: f32[128,128], index: 1, kind: input, shape index: {}]   ;;  %s668_s2 = inlined_call_operand.vmem [shape: f32[8,4], index: 2, kind: input, shape index: {}]   ;;  %s669_s3 = inlined_call_operand.vmem [shape: f32[8,1], index: 3, kind: input, shape index: {}]   ;;  %s670_s4 = inlined_call_operand.hbm [shape: f32[2,8,128], index: 4, kind: output, shape index: {}]  }
   0x1   :  { %10 = vsyncpa [#allocation4], 0 }
   0x2   :  { %12 = vsyncpa [#allocation4 + $0x1], 0  ;;  %s565_s15 = smov 0   ;;  %s567_s16 = smov 0  }
   0x3   :  { %s569_s17 = smov 0   ;;  %s571_s18 = smov 0  }
   0x4 LB: > { %s586_s19 = sadd.s32 4294967295, %s534_s18   ;;  %s370_s20 = sadd.s32 4294967294, %s534_s18   ;;  %s534_s18 = sphi %s571_s18, %s676_s18   ;;  %s530_s17 = sphi %s569_s17, %s675_s17   ;;  %s526_s16 = sphi %s567_s16, %s674_s16   ;;  %s522_s15 = sphi %s565_s15, %s673_s15  }
   0x5   : > { %s590_s21 = sadd.s32 1, %s534_s18   ;;  %s114_s22 = sadd.s32 1, %s530_s17 }
   0x6   : > { %s111_s23 = ssub.s32 %s534_s18, %s590_s21  ;;  %p124_p0 = scmp.ne.s32.totalorder %s530_s17, %s526_s16 }
   0x7   : > { %p112_p1 = scmp.eq.s32.totalorder %s111_s23, 0  ;;  %p125_p2 = scmp.eq.s32.totalorder %s586_s19, 1 }
   0x8   : > { %p130_p3 = scmp.ne.s32.totalorder %s526_s16, %s522_s15  ;;  %p131_p4 = scmp.eq.s32.totalorder %s370_s20, 1 }
   0x9   : > { %s601_s24 = scalar_select %p112_p1, %s530_s17, %s114_s22  }
   0xa   : > { %p603_p5 = por %p125_p2, %p124_p0  ;;  %p607_p6 = por %p131_p4, %p130_p3 }
   0xb   : > { %p371_p7 = scmp.ge.s32.totalorder %s534_s18, 1  ;;  %p138_p8 = scmp.lt.s32.totalorder %s534_s18, 3 }
   0xc   : > { %p398_p9 = scmp.eq.s32.totalorder %s586_s19, 0  ;;  %s149_s29 = sshll.u32 %s667_s1, 4  ;;  %s150_s29 = int_to_ptr.hbm [resolvable:$true] %s149_s29 }
   0xd   : > { %p139_p10 = pnand %p371_p7, %p138_p8  ;;  %s536_s30 = smov [#allocation2]  }
   0xe   : > { %s151_s5 = sshll.u32 %s536_s30, 4  ;;  %s537_s6 = smov 128   ;;  %s152_s5 = int_to_ptr.vmem [resolvable:$true] %s151_s5 }
   0xf   : > { %p390_p11 = pneg %p139_p10  ;;  %s538_s7 = smov 8  }
  0x10   : > { %180 = sbr.rel (%p139_p10) target bundleno = 287 (0x11f), region = 36 }
  0x11   : > { %p391_p12 = pnand %p398_p9, %p390_p11 }
  0x13   : > { %393 = dma.hbm_to_vmem [thread:$0]  (!%p391_p12), %s150_s29, 2048, %s152_s5, [#allocation3], %s537_s6, %s537_s6, %s538_s7  }
  0x15   : > { %513 = dma.done.wait (%p398_p9), [#allocation3], 2048  }
  0x16   : > { %515 = vsyncadd (%p398_p9), [#allocation3], 4294965248  ;;  %p206_p13 = scmp.lt.s32.totalorder %s586_s19, 1  ;;  %v539_v0 = vmov 0   ;;  %vm222_vm0 = vcmask 1043456   ;;  %vm218_vm1 = vcmask 31744  }
  0x17   : > { %437 = vset.pattern.permute.xlu0 %v539_v0  ;;  %v211_v2 = vld [vmem:[%s668_s2] sm:$0xff]  ;;  %v261_v4 = vld [vmem:[#allocation2 + $0x78] sm:$0xff]  ;;  %v260_v5 = vld [vmem:[#allocation2 + $0x70] sm:$0xff]  ;;  %s203_s23 = sand.u32 1, %s526_s16   ;;  %s381_s28 = sshll.u32 %s586_s19, 3 }
  0x18   : > { %s207_s8 = scalar_select %p206_p13, %s586_s19, 1  ;;  %v212_v3 = vld [vmem:[%s669_s3] sm:$0xff]  ;;  %262 = vmatpush.msra.mxu1 %v261_v4  ;;  %v259_v6 = vld [vmem:[#allocation2 + $0x68] sm:$0xff]  ;;  %v257_v8 = vld [vmem:[#allocation2 + $0x58] sm:$0xff] }
  0x19   : > { %215 = vperm.xlu0 %437, %v212_v3   ;;  %v258_v7 = vld [vmem:[#allocation2 + $0x60] sm:$0xff]  ;;  %v256_v9 = vld [vmem:[#allocation2 + $0x50] sm:$0xff]  ;;  %v255_v10 = vld [vmem:[#allocation2 + $0x48] sm:$0xff]  ;;  %s376_s27 = sshll.u32 %s203_s23, 3  ;;  %s294_s5 = scalar_lea.hbm %s670_s4, %s381_s28 }
  0x1a   : > { %s377_s9 = sshll.u32 %s207_s8, 2  ;;  %263 = vmatpush.msra.mxu1 %v260_v5  ;;  %v254_v11 = vld [vmem:[#allocation2 + $0x40] sm:$0xff]  ;;  %v253_v12 = vld [vmem:[#allocation2 + $0x38] sm:$0xff]  ;;  %v252_v13 = vld [vmem:[#allocation2 + $0x30] sm:$0xff]  ;;  %s205_s6 = scalar_lea.vmem [#allocation5], %s376_s27 }
  0x1b   : > { %s209_s12 = scalar_lea.vmem %s666_s0, %s377_s9  ;;  %v251_v14 = vld [vmem:[#allocation2 + $0x28] sm:$0xff]  ;;  %v250_v15 = vld [vmem:[#allocation2 + $0x20] sm:$0xff]  ;;  %v249_v16 = vld [vmem:[#allocation2 + $0x18] sm:$0xff]  ;;  %s296_s7 = sshll.u32 %s205_s6, 4  ;;  %s297_s7 = int_to_ptr.vmem [resolvable:$true] %s296_s7 }
  0x1c   : > { %v210_v1 = vld [vmem:[%s209_s12] sm:$0xf]  ;;  %264 = vmatpush.msra.mxu1 %v259_v6  ;;  %v248_v17 = vld [vmem:[#allocation2 + $0x10] sm:$0xff]  ;;  %v247_v18 = vld [vmem:[#allocation2 + $0x8] sm:$0xff]  ;;  %s298_s8 = sshll.u32 %s294_s5, 4  ;;  %s284_s9 = scalar_lea.sflag [#allocation4], %s203_s23  ;;  %s299_s8 = int_to_ptr.hbm [resolvable:$true] %s298_s8 }
  0x1d   : > { %378 = vmatpush.msk.msra.mxu0 %vm222_vm0, %v210_v1  ;;  %v246_v19 = vld [vmem:[#allocation2] sm:$0xff]  ;;  %s482_s10 = sshra.s32 %s299_s8, 4  ;;  %s488_s13 = scalar_lea.hbm %s670_s4, 16  ;;  %s483_s10 = int_to_ptr.hbm [resolvable:$true] %s482_s10 }
  0x1e   : > { %379 = vmatmul.msk.f32.vlgmr.msra.gmra.mxu0 %vm218_vm1, %v211_v2  ;;  %265 = vmatpush.msra.mxu1 %v258_v7  ;;  %s484_s11 = scalar_lea.hbm %s483_s10, 8  ;;  %p489_p3 = scmp.lt.s32.totalorder %s483_s10, %s670_s4 }
  0x1f   : > { %p485_p0 = scmp.ne.s32.totalorder %s483_s10, %s484_s11  ;;  %p490_p4 = scmp.lt.s32.totalorder %s488_s13, %s484_s11 }
  0x20   : > { %266 = vmatpush.msra.mxu1 %v257_v8 }
  0x21   : > { %p486_p1 = pnand %p485_p0, %p603_p5  ;;  %p491_p7 = por %p490_p4, %p489_p3 }
  0x22   : > { %267 = vmatpush.msra.mxu1 %v256_v9 }
  0x23   : > { %p487_p2 = pneg %p486_p1 }
  0x24   : > { %268 = vmatpush.msra.mxu1 %v255_v10 }
  0x25   : > { %p492_p8 = pnand %p491_p7, %p487_p2 }
  0x26   : > { %269 = vmatpush.msra.mxu1 %v254_v11 }
  0x28   : > { %270 = vmatpush.msra.mxu1 %v253_v12 }
  0x2a   : > { %271 = vmatpush.msra.mxu1 %v252_v13 }
  0x2c   : > { %272 = vmatpush.msra.mxu1 %v251_v14 }
  0x2e   : > { %273 = vmatpush.msra.mxu1 %v250_v15 }
  0x30   : > { %274 = vmatpush.msra.mxu1 %v249_v16 }
  0x32   : > { %275 = vmatpush.msra.mxu1 %v248_v17 }
  0x34   : > { %276 = vmatpush.msra.mxu1 %v247_v18 }
  0x36   : > { %277 = vmatpush.msra.mxu1 %v246_v19 }
  0x8b   : > { %v216_v20 = vpop.permute.xlu0 %215 }
  0x9b   : > { %v243_v21 = vpop.f32.mrf.mxu0 }
  0x9c   : > { %v244_v22 = vadd.f32 %v243_v21, %v216_v20 }
  0x9e   : > { %278 = vmatmul.f32.vlgmr.msra.gmra.mxu1 %v244_v22 }
 0x11b   : > { %v279_v23 = vpop.f32.mrf.mxu1 }
 0x11c   : > { %282 = vst [vmem:[%s205_s6] sm:$0xff] %v279_v23 }
 0x11d   : > { %495 = shalt.err (!%p492_p8)
}
 0x11e   : > { %388 = dma.vmem_to_hbm [thread:$0]  (%p603_p5), %s297_s7, 128, %s299_s8, %s284_s9  }
 0x11f PF: > { %p400_p9 = scmp.ge.s32.totalorder %s534_s18, 2  ;;  %s310_s22 = sand.u32 1, %s522_s15  }
 0x120   : > { %s311_s23 = scalar_lea.sflag [#allocation4], %s310_s22 }
 0x121   : > { %p395_p10 = pnand %p400_p9, %p607_p6 }
 0x123   : > { %p396_p11 = pneg %p395_p10 }
 0x125   : > { %517 = dma.done.wait (%p396_p11), %s311_s23, 128  }
 0x126   : > { %519 = vsyncadd (%p396_p11), %s311_s23, 4294967168  ;;  %p15_p12 = scmp.ge.s32.totalorder %s590_s21, 4   ;;  %s673_s15 = smov %s526_s16 }
 0x127   : > { %s674_s16 = smov %s530_s17  ;;  %s675_s17 = smov %s601_s24 }
 0x128   : > { %s676_s18 = smov %s590_s21  ;;  %17 = sbr.rel (!%p15_p12) target bundleno = 4 (0x4), region = 76 }
 0x12d   :  { %317 = vsyncpa [#allocation3], 1 }
 0x12e   :  { %319 = vsyncpa [#allocation3 + $0x1], 1 }
 0x12f   :  { %320 = vsyncpa [#allocation4], 1 }
 0x130   :  { %322 = vsyncpa [#allocation4 + $0x1], 1 }

</bundles_post_ra>
